<compile_context>
chip_gen: v5e
topology: v5e:2x2
jax: 0.10.0
libtpu: 0.0.40
codegen_flags: <defaults>
</compile_context>

<pallas_src>
import functools

import jax
import jax.numpy as jnp
from jax.experimental import pallas as pl
from jax.experimental.pallas import tpu as pltpu

MIN_VALUE = -2.0
MAX_VALUE = 12.0

K_IN = 3   # conv_transpose3d in_channels
N_CT = 2   # conv_transpose3d out_channels  (becomes Conv2d "batch")
C_D = 3    # depth of x8 (becomes Conv2d "channels")
CO = 3     # conv2d out_channels

P_IN = K_IN * C_D     # 9 fused input channels  (p = k*3 + ci)
Q_OUT = N_CT * CO     # 6 fused output channels (q = n*3 + co)

LANES = 128
MAX_TILE_ROWS = 1024          # 1024*128 lanes/block; ~15 MiB double-buffered in+out
MIN_SPLIT_ROWS = 144          # only split across TensorCores if each half >= ~2 MiB
VMEM_LIMIT_BYTES = 32 * 1024 * 1024


def _round_up(x, m):
    return ((x + m - 1) // m) * m


def _device_kind():
    try:
        return jax.devices()[0].device_kind.lower()
    except Exception:  # pragma: no cover - defensive
        return ""


_DEVICE_KIND = _device_kind()
_IS_V7X = ("v7" in _DEVICE_KIND) or ("7x" in _DEVICE_KIND)
_NUM_TC = 2 if _IS_V7X else 1   # v5e/v6e: 1 TensorCore -> grid is a serial loop


def _choose_tile_rows(rows, num_tc):
    """Sublane-row tile: as big as VMEM allows; split only when it pays off."""
    if rows <= MAX_TILE_ROWS and num_tc <= 1:
        return rows                       # one block, no forced split, no row padding
    tr = min(_round_up(rows, 8), MAX_TILE_ROWS)
    if num_tc > 1:
        per_tc = _round_up(pl.cdiv(rows, num_tc), 8)
        if MIN_SPLIT_ROWS <= per_tc < tr:
            tr = per_tc                   # one (or more) block per TensorCore
        elif per_tc < MIN_SPLIT_ROWS and rows <= MAX_TILE_ROWS:
            tr = rows                     # too small to be worth splitting
    return tr


def _fuse_params(w1, b1, w2, b2):
    """Fold ConvTranspose3d(1x1x1) and Conv2d(1x1) into one (6,9) contraction."""
    # z[n,co] = sum_{k,ci} w1[k,n]*w2[co,ci]*x[k,ci] + (b1[n]*sum_ci w2[co,ci] + b2[co])
    w_fused = jnp.einsum("kn,oc->nokc", w1, w2).reshape(Q_OUT, P_IN)
    b_fused = (b1[:, None] * jnp.sum(w2, axis=1)[None, :] + b2[None, :]).reshape(Q_OUT)
    return w_fused.astype(jnp.float32), b_fused.astype(jnp.float32)


# ----------------------------------------------------------------------------
# VPU path (v5e / v6e / default): HBM-bound, channel contraction on the VPU.
# ----------------------------------------------------------------------------
def _vpu_kernel(x_ref, w_ref, b_ref, o_ref):
    """One spatial tile.

    x_ref : (9, TR, 128) f32 VMEM   fused input channels x spatial rows x lanes
    w_ref : (6, 9)       f32 SMEM   fused weight  W[q, p]
    b_ref : (6,)         f32 SMEM   fused bias    b[q]
    o_ref : (6, TR, 128) f32 VMEM
    """
    for q in range(Q_OUT):
        z = x_ref[0] * w_ref[q, 0]
        for p in range(1, P_IN):
            z = z + x_ref[p] * w_ref[q, p]
        z = z + b_ref[q]
        # Per-plane dense store (lane dim 128, sublane rows multiple of 8).
        o_ref[q] = jnp.minimum(jnp.maximum(z, MIN_VALUE), MAX_VALUE)


@jax.jit
def _forward_vpu(x, w1, b1, w2, b2):
    k, d, h, w = x.shape
    assert (k, d) == (K_IN, C_D)
    s = h * w
    w_fused, b_fused = _fuse_params(w1, b1, w2, b2)

    x_flat = x.reshape(P_IN, s)
    rows = pl.cdiv(s, LANES)
    s_pad = rows * LANES
    if s_pad != s:
        # Pad only to the next lane multiple (needed for the (rows,128) re-layout).
        x_flat = jnp.pad(x_flat, ((0, 0), (0, s_pad - s)))
    x_tiled = x_flat.reshape(P_IN, rows, LANES)

    tile_rows = _choose_tile_rows(rows, _NUM_TC)
    grid = (pl.cdiv(rows, tile_rows),)

    smem_spec = pl.BlockSpec(memory_space=pltpu.MemorySpace.SMEM)
    out = pl.pallas_call(
        _vpu_kernel,
        out_shape=jax.ShapeDtypeStruct((Q_OUT, rows, LANES), jnp.float32),
        grid_spec=pltpu.PrefetchScalarGridSpec(
            num_scalar_prefetch=0,
            grid=grid,
            in_specs=[
                pl.BlockSpec((P_IN, tile_rows, LANES), lambda i: (0, i, 0)),
                smem_spec,  # fused weight
                smem_spec,  # fused bias
            ],
            out_specs=pl.BlockSpec((Q_OUT, tile_rows, LANES), lambda i: (0, i, 0)),
        ),
        compiler_params=pltpu.CompilerParams(
            dimension_semantics=("parallel",),
            vmem_limit_bytes=VMEM_LIMIT_BYTES),
        cost_estimate=pl.CostEstimate(
            flops=2 * Q_OUT * P_IN * s_pad,
            transcendentals=0,
            bytes_accessed=4 * (P_IN + Q_OUT) * s_pad),
    )(x_tiled, w_fused, b_fused)

    out = out.reshape(Q_OUT, s_pad)
    if s_pad != s:
        out = out[:, :s]
    return out.reshape(N_CT, CO, h, w)


# ----------------------------------------------------------------------------
# MXU path (v7x only): HBM is fast enough there that the 9->6 VPU contraction
# binds; push it onto the otherwise-idle MXU.  2-D layout, no host pad/slice.
# ----------------------------------------------------------------------------
def _mxu_kernel(x_ref, w_ref, b_ref, o_ref):
    """x_ref: (9, TS) VMEM; w_ref: (6, 9) VMEM; b_ref: (6, 1) VMEM; o_ref: (6, TS)."""
    z = jnp.dot(w_ref[...], x_ref[...], preferred_element_type=jnp.float32)
    z = z + b_ref[...]
    o_ref[...] = jnp.minimum(jnp.maximum(z, MIN_VALUE), MAX_VALUE)


@jax.jit
def _forward_mxu(x, w1, b1, w2, b2):
    k, d, h, w = x.shape
    assert (k, d) == (K_IN, C_D)
    s = h * w
    w_fused, b_fused = _fuse_params(w1, b1, w2, b2)

    x_flat = x.reshape(P_IN, s)
    rows = pl.cdiv(s, LANES)
    tile_rows = _choose_tile_rows(rows, _NUM_TC)
    tile_s = s if tile_rows >= rows else tile_rows * LANES  # full extent or 128-mult
    grid = (pl.cdiv(s, tile_s),)

    out = pl.pallas_call(
        _mxu_kernel,
        out_shape=jax.ShapeDtypeStruct((Q_OUT, s), jnp.float32),
        grid_spec=pltpu.PrefetchScalarGridSpec(
            num_scalar_prefetch=0,
            grid=grid,
            in_specs=[
                pl.BlockSpec((P_IN, tile_s), lambda i: (0, i)),
                pl.BlockSpec((Q_OUT, P_IN), lambda i: (0, 0)),
                pl.BlockSpec((Q_OUT, 1), lambda i: (0, 0)),
            ],
            out_specs=pl.BlockSpec((Q_OUT, tile_s), lambda i: (0, i)),
        ),
        compiler_params=pltpu.CompilerParams(
            dimension_semantics=("parallel",),
            vmem_limit_bytes=VMEM_LIMIT_BYTES),
        cost_estimate=pl.CostEstimate(
            flops=2 * Q_OUT * P_IN * s,
            transcendentals=0,
            bytes_accessed=4 * (P_IN + Q_OUT) * s),
    )(x_flat, w_fused, b_fused[:, None])

    return out.reshape(N_CT, CO, h, w)


def fused_forward(x, w1, b1, w2, b2):
    """x: (3, 3, H, W) float32 -> (2, 3, H, W) float32."""
    if _IS_V7X:
        try:
            return _forward_mxu(x, w1, b1, w2, b2)
        except Exception:
            # If MXU lowering is rejected, fall back to the portable VPU path.
            pass
    return _forward_vpu(x, w1, b1, w2, b2)


def reference_forward(x, w1, b1, w2, b2):
    """Pure-JAX reference of the same semantics (two-stage, un-fused)."""
    # ConvTranspose3d(3, 2, 1x1x1), unbatched input (3, D, H, W) -> (2, D, H, W)
    y = jnp.einsum("kn,kdhw->ndhw", w1, x) + b1[:, None, None, None]
    # Conv2d(3, 3, 1x1) on (N=2, C=3, H, W)
    z = jnp.einsum("oc,nchw->nohw", w2, y) + b2[None, :, None, None]
    return jnp.clip(z, MIN_VALUE, MAX_VALUE)


if __name__ == "__main__":
    key = jax.random.PRNGKey(0)
    kx, k1, k2, k3, k4 = jax.random.split(key, 5)

    # Spatial dims from the original script (H=36, W=56): S=2016, not a
    # multiple of 128 -> exercises the padded-tail path.
    H, W = 36, 56
    x8 = jax.random.normal(kx, (K_IN, C_D, H, W), dtype=jnp.float32)

    # Parameter shapes match the PyTorch module, 1x1(x1) kernel dims squeezed.
    w1 = 0.5 * jax.random.normal(k1, (K_IN, N_CT), dtype=jnp.float32)  # ConvTranspose3d.weight
    b1 = 0.1 * jax.random.normal(k2, (N_CT,), dtype=jnp.float32)       # ConvTranspose3d.bias
    w2 = 0.5 * jax.random.normal(k3, (CO, C_D), dtype=jnp.float32)     # Conv2d.weight
    b2 = 0.1 * jax.random.normal(k4, (CO,), dtype=jnp.float32)         # Conv2d.bias

    out = jax.block_until_ready(fused_forward(x8, w1, b1, w2, b2))

    ref = reference_forward(x8, w1, b1, w2, b2)
    assert out.shape == (N_CT, CO, H, W)
    # Host-fused weights may differ from the two-stage reference by ~1 ulp.
    assert jnp.allclose(out, ref, atol=1e-4, rtol=1e-4), "mismatch vs JAX reference"

    print("KERNEL_OK")
</pallas_src>

<mosaic_0001>
module attributes {stable_mosaic.version = 11 : i64} {
  func.func @_vpu_kernel(%arg0: i32, %arg1: memref<9x16x128xf32, #tpu.memory_space<vmem>>, %arg2: memref<6x9xf32, #tpu.memory_space<smem>>, %arg3: memref<6xf32, #tpu.memory_space<smem>>, %arg4: memref<6x16x128xf32, #tpu.memory_space<vmem>>) attributes {dimension_semantics = [#tpu.dimension_semantics<parallel>], iteration_bounds = array<i64: 1>, scalar_prefetch = 0 : i64, scratch_operands = 0 : i64, tpu.core_type = #tpu.core_type<tc>, window_params = [{transform_indices = @transform_0, window_bounds = array<i64: 9, 16, 128>}, {transform_indices = @transform_1, window_bounds = array<i64: 6, 9>}, {transform_indices = @transform_2, window_bounds = array<i64: 6>}, {transform_indices = @transform_3, window_bounds = array<i64: 6, 16, 128>}]} {
    %c0 = arith.constant 0 : index
    %c0_0 = arith.constant 0 : index
    %c0_1 = arith.constant 0 : index
    %0 = vector.load %arg1[%c0, %c0_0, %c0_1] : memref<9x16x128xf32, #tpu.memory_space<vmem>>, vector<1x16x128xf32>
    %1 = vector.shape_cast %0 : vector<1x16x128xf32> to vector<16x128xf32>
    %c0_2 = arith.constant 0 : index
    %c0_3 = arith.constant 0 : index
    %2 = memref.load %arg2[%c0_2, %c0_3] : memref<6x9xf32, #tpu.memory_space<smem>>
    %3 = vector.broadcast %2 : f32 to vector<16x128xf32>
    %4 = arith.mulf %1, %3 : vector<16x128xf32>
    %c1 = arith.constant 1 : index
    %c0_4 = arith.constant 0 : index
    %c0_5 = arith.constant 0 : index
    %5 = vector.load %arg1[%c1, %c0_4, %c0_5] : memref<9x16x128xf32, #tpu.memory_space<vmem>>, vector<1x16x128xf32>
    %6 = vector.shape_cast %5 : vector<1x16x128xf32> to vector<16x128xf32>
    %c0_6 = arith.constant 0 : index
    %c1_7 = arith.constant 1 : index
    %7 = memref.load %arg2[%c0_6, %c1_7] : memref<6x9xf32, #tpu.memory_space<smem>>
    %8 = vector.broadcast %7 : f32 to vector<16x128xf32>
    %9 = arith.mulf %6, %8 : vector<16x128xf32>
    %10 = arith.addf %4, %9 : vector<16x128xf32>
    %c2 = arith.constant 2 : index
    %c0_8 = arith.constant 0 : index
    %c0_9 = arith.constant 0 : index
    %11 = vector.load %arg1[%c2, %c0_8, %c0_9] : memref<9x16x128xf32, #tpu.memory_space<vmem>>, vector<1x16x128xf32>
    %12 = vector.shape_cast %11 : vector<1x16x128xf32> to vector<16x128xf32>
    %c0_10 = arith.constant 0 : index
    %c2_11 = arith.constant 2 : index
    %13 = memref.load %arg2[%c0_10, %c2_11] : memref<6x9xf32, #tpu.memory_space<smem>>
    %14 = vector.broadcast %13 : f32 to vector<16x128xf32>
    %15 = arith.mulf %12, %14 : vector<16x128xf32>
    %16 = arith.addf %10, %15 : vector<16x128xf32>
    %c3 = arith.constant 3 : index
    %c0_12 = arith.constant 0 : index
    %c0_13 = arith.constant 0 : index
    %17 = vector.load %arg1[%c3, %c0_12, %c0_13] : memref<9x16x128xf32, #tpu.memory_space<vmem>>, vector<1x16x128xf32>
    %18 = vector.shape_cast %17 : vector<1x16x128xf32> to vector<16x128xf32>
    %c0_14 = arith.constant 0 : index
    %c3_15 = arith.constant 3 : index
    %19 = memref.load %arg2[%c0_14, %c3_15] : memref<6x9xf32, #tpu.memory_space<smem>>
    %20 = vector.broadcast %19 : f32 to vector<16x128xf32>
    %21 = arith.mulf %18, %20 : vector<16x128xf32>
    %22 = arith.addf %16, %21 : vector<16x128xf32>
    %c4 = arith.constant 4 : index
    %c0_16 = arith.constant 0 : index
    %c0_17 = arith.constant 0 : index
    %23 = vector.load %arg1[%c4, %c0_16, %c0_17] : memref<9x16x128xf32, #tpu.memory_space<vmem>>, vector<1x16x128xf32>
    %24 = vector.shape_cast %23 : vector<1x16x128xf32> to vector<16x128xf32>
    %c0_18 = arith.constant 0 : index
    %c4_19 = arith.constant 4 : index
    %25 = memref.load %arg2[%c0_18, %c4_19] : memref<6x9xf32, #tpu.memory_space<smem>>
    %26 = vector.broadcast %25 : f32 to vector<16x128xf32>
    %27 = arith.mulf %24, %26 : vector<16x128xf32>
    %28 = arith.addf %22, %27 : vector<16x128xf32>
    %c5 = arith.constant 5 : index
    %c0_20 = arith.constant 0 : index
    %c0_21 = arith.constant 0 : index
    %29 = vector.load %arg1[%c5, %c0_20, %c0_21] : memref<9x16x128xf32, #tpu.memory_space<vmem>>, vector<1x16x128xf32>
    %30 = vector.shape_cast %29 : vector<1x16x128xf32> to vector<16x128xf32>
    %c0_22 = arith.constant 0 : index
    %c5_23 = arith.constant 5 : index
    %31 = memref.load %arg2[%c0_22, %c5_23] : memref<6x9xf32, #tpu.memory_space<smem>>
    %32 = vector.broadcast %31 : f32 to vector<16x128xf32>
    %33 = arith.mulf %30, %32 : vector<16x128xf32>
    %34 = arith.addf %28, %33 : vector<16x128xf32>
    %c6 = arith.constant 6 : index
    %c0_24 = arith.constant 0 : index
    %c0_25 = arith.constant 0 : index
    %35 = vector.load %arg1[%c6, %c0_24, %c0_25] : memref<9x16x128xf32, #tpu.memory_space<vmem>>, vector<1x16x128xf32>
    %36 = vector.shape_cast %35 : vector<1x16x128xf32> to vector<16x128xf32>
    %c0_26 = arith.constant 0 : index
    %c6_27 = arith.constant 6 : index
    %37 = memref.load %arg2[%c0_26, %c6_27] : memref<6x9xf32, #tpu.memory_space<smem>>
    %38 = vector.broadcast %37 : f32 to vector<16x128xf32>
    %39 = arith.mulf %36, %38 : vector<16x128xf32>
    %40 = arith.addf %34, %39 : vector<16x128xf32>
    %c7 = arith.constant 7 : index
    %c0_28 = arith.constant 0 : index
    %c0_29 = arith.constant 0 : index
    %41 = vector.load %arg1[%c7, %c0_28, %c0_29] : memref<9x16x128xf32, #tpu.memory_space<vmem>>, vector<1x16x128xf32>
    %42 = vector.shape_cast %41 : vector<1x16x128xf32> to vector<16x128xf32>
    %c0_30 = arith.constant 0 : index
    %c7_31 = arith.constant 7 : index
    %43 = memref.load %arg2[%c0_30, %c7_31] : memref<6x9xf32, #tpu.memory_space<smem>>
    %44 = vector.broadcast %43 : f32 to vector<16x128xf32>
    %45 = arith.mulf %42, %44 : vector<16x128xf32>
    %46 = arith.addf %40, %45 : vector<16x128xf32>
    %c8 = arith.constant 8 : index
    %c0_32 = arith.constant 0 : index
    %c0_33 = arith.constant 0 : index
    %47 = vector.load %arg1[%c8, %c0_32, %c0_33] : memref<9x16x128xf32, #tpu.memory_space<vmem>>, vector<1x16x128xf32>
    %48 = vector.shape_cast %47 : vector<1x16x128xf32> to vector<16x128xf32>
    %c0_34 = arith.constant 0 : index
    %c8_35 = arith.constant 8 : index
    %49 = memref.load %arg2[%c0_34, %c8_35] : memref<6x9xf32, #tpu.memory_space<smem>>
    %50 = vector.broadcast %49 : f32 to vector<16x128xf32>
    %51 = arith.mulf %48, %50 : vector<16x128xf32>
    %52 = arith.addf %46, %51 : vector<16x128xf32>
    %c0_36 = arith.constant 0 : index
    %53 = memref.load %arg3[%c0_36] : memref<6xf32, #tpu.memory_space<smem>>
    %54 = vector.broadcast %53 : f32 to vector<16x128xf32>
    %55 = arith.addf %52, %54 : vector<16x128xf32>
    %cst = arith.constant -2.000000e+00 : f32
    %56 = vector.broadcast %cst : f32 to vector<16x128xf32>
    %57 = arith.maximumf %55, %56 : vector<16x128xf32>
    %cst_37 = arith.constant 1.200000e+01 : f32
    %58 = vector.broadcast %cst_37 : f32 to vector<16x128xf32>
    %59 = arith.minimumf %57, %58 : vector<16x128xf32>
    %c0_38 = arith.constant 0 : index
    %c0_39 = arith.constant 0 : index
    %c0_40 = arith.constant 0 : index
    %60 = vector.load %arg4[%c0_38, %c0_39, %c0_40] : memref<6x16x128xf32, #tpu.memory_space<vmem>>, vector<1x16x128xf32>
    %61 = vector.shape_cast %60 : vector<1x16x128xf32> to vector<16x128xf32>
    %62 = vector.shape_cast %59 : vector<16x128xf32> to vector<1x16x128xf32>
    tpu.vector_store %arg4[%c0_38, %c0_39, %c0_40], %62 {strides = array<i32>} : memref<6x16x128xf32, #tpu.memory_space<vmem>>, vector<1x16x128xf32>,
    %c0_41 = arith.constant 0 : index
    %c0_42 = arith.constant 0 : index
    %c0_43 = arith.constant 0 : index
    %63 = vector.load %arg1[%c0_41, %c0_42, %c0_43] : memref<9x16x128xf32, #tpu.memory_space<vmem>>, vector<1x16x128xf32>
    %64 = vector.shape_cast %63 : vector<1x16x128xf32> to vector<16x128xf32>
    %c1_44 = arith.constant 1 : index
    %c0_45 = arith.constant 0 : index
    %65 = memref.load %arg2[%c1_44, %c0_45] : memref<6x9xf32, #tpu.memory_space<smem>>
    %66 = vector.broadcast %65 : f32 to vector<16x128xf32>
    %67 = arith.mulf %64, %66 : vector<16x128xf32>
    %c1_46 = arith.constant 1 : index
    %c0_47 = arith.constant 0 : index
    %c0_48 = arith.constant 0 : index
    %68 = vector.load %arg1[%c1_46, %c0_47, %c0_48] : memref<9x16x128xf32, #tpu.memory_space<vmem>>, vector<1x16x128xf32>
    %69 = vector.shape_cast %68 : vector<1x16x128xf32> to vector<16x128xf32>
    %c1_49 = arith.constant 1 : index
    %c1_50 = arith.constant 1 : index
    %70 = memref.load %arg2[%c1_49, %c1_50] : memref<6x9xf32, #tpu.memory_space<smem>>
    %71 = vector.broadcast %70 : f32 to vector<16x128xf32>
    %72 = arith.mulf %69, %71 : vector<16x128xf32>
    %73 = arith.addf %67, %72 : vector<16x128xf32>
    %c2_51 = arith.constant 2 : index
    %c0_52 = arith.constant 0 : index
    %c0_53 = arith.constant 0 : index
    %74 = vector.load %arg1[%c2_51, %c0_52, %c0_53] : memref<9x16x128xf32, #tpu.memory_space<vmem>>, vector<1x16x128xf32>
    %75 = vector.shape_cast %74 : vector<1x16x128xf32> to vector<16x128xf32>
    %c1_54 = arith.constant 1 : index
    %c2_55 = arith.constant 2 : index
    %76 = memref.load %arg2[%c1_54, %c2_55] : memref<6x9xf32, #tpu.memory_space<smem>>
    %77 = vector.broadcast %76 : f32 to vector<16x128xf32>
    %78 = arith.mulf %75, %77 : vector<16x128xf32>
    %79 = arith.addf %73, %78 : vector<16x128xf32>
    %c3_56 = arith.constant 3 : index
    %c0_57 = arith.constant 0 : index
    %c0_58 = arith.constant 0 : index
    %80 = vector.load %arg1[%c3_56, %c0_57, %c0_58] : memref<9x16x128xf32, #tpu.memory_space<vmem>>, vector<1x16x128xf32>
    %81 = vector.shape_cast %80 : vector<1x16x128xf32> to vector<16x128xf32>
    %c1_59 = arith.constant 1 : index
    %c3_60 = arith.constant 3 : index
    %82 = memref.load %arg2[%c1_59, %c3_60] : memref<6x9xf32, #tpu.memory_space<smem>>
    %83 = vector.broadcast %82 : f32 to vector<16x128xf32>
    %84 = arith.mulf %81, %83 : vector<16x128xf32>
    %85 = arith.addf %79, %84 : vector<16x128xf32>
    %c4_61 = arith.constant 4 : index
    %c0_62 = arith.constant 0 : index
    %c0_63 = arith.constant 0 : index
    %86 = vector.load %arg1[%c4_61, %c0_62, %c0_63] : memref<9x16x128xf32, #tpu.memory_space<vmem>>, vector<1x16x128xf32>
    %87 = vector.shape_cast %86 : vector<1x16x128xf32> to vector<16x128xf32>
    %c1_64 = arith.constant 1 : index
    %c4_65 = arith.constant 4 : index
    %88 = memref.load %arg2[%c1_64, %c4_65] : memref<6x9xf32, #tpu.memory_space<smem>>
    %89 = vector.broadcast %88 : f32 to vector<16x128xf32>
    %90 = arith.mulf %87, %89 : vector<16x128xf32>
    %91 = arith.addf %85, %90 : vector<16x128xf32>
    %c5_66 = arith.constant 5 : index
    %c0_67 = arith.constant 0 : index
    %c0_68 = arith.constant 0 : index
    %92 = vector.load %arg1[%c5_66, %c0_67, %c0_68] : memref<9x16x128xf32, #tpu.memory_space<vmem>>, vector<1x16x128xf32>
    %93 = vector.shape_cast %92 : vector<1x16x128xf32> to vector<16x128xf32>
    %c1_69 = arith.constant 1 : index
    %c5_70 = arith.constant 5 : index
    %94 = memref.load %arg2[%c1_69, %c5_70] : memref<6x9xf32, #tpu.memory_space<smem>>
    %95 = vector.broadcast %94 : f32 to vector<16x128xf32>
    %96 = arith.mulf %93, %95 : vector<16x128xf32>
    %97 = arith.addf %91, %96 : vector<16x128xf32>
    %c6_71 = arith.constant 6 : index
    %c0_72 = arith.constant 0 : index
    %c0_73 = arith.constant 0 : index
    %98 = vector.load %arg1[%c6_71, %c0_72, %c0_73] : memref<9x16x128xf32, #tpu.memory_space<vmem>>, vector<1x16x128xf32>
    %99 = vector.shape_cast %98 : vector<1x16x128xf32> to vector<16x128xf32>
    %c1_74 = arith.constant 1 : index
    %c6_75 = arith.constant 6 : index
    %100 = memref.load %arg2[%c1_74, %c6_75] : memref<6x9xf32, #tpu.memory_space<smem>>
    %101 = vector.broadcast %100 : f32 to vector<16x128xf32>
    %102 = arith.mulf %99, %101 : vector<16x128xf32>
    %103 = arith.addf %97, %102 : vector<16x128xf32>
    %c7_76 = arith.constant 7 : index
    %c0_77 = arith.constant 0 : index
    %c0_78 = arith.constant 0 : index
    %104 = vector.load %arg1[%c7_76, %c0_77, %c0_78] : memref<9x16x128xf32, #tpu.memory_space<vmem>>, vector<1x16x128xf32>
    %105 = vector.shape_cast %104 : vector<1x16x128xf32> to vector<16x128xf32>
    %c1_79 = arith.constant 1 : index
    %c7_80 = arith.constant 7 : index
    %106 = memref.load %arg2[%c1_79, %c7_80] : memref<6x9xf32, #tpu.memory_space<smem>>
    %107 = vector.broadcast %106 : f32 to vector<16x128xf32>
    %108 = arith.mulf %105, %107 : vector<16x128xf32>
    %109 = arith.addf %103, %108 : vector<16x128xf32>
    %c8_81 = arith.constant 8 : index
    %c0_82 = arith.constant 0 : index
    %c0_83 = arith.constant 0 : index
    %110 = vector.load %arg1[%c8_81, %c0_82, %c0_83] : memref<9x16x128xf32, #tpu.memory_space<vmem>>, vector<1x16x128xf32>
    %111 = vector.shape_cast %110 : vector<1x16x128xf32> to vector<16x128xf32>
    %c1_84 = arith.constant 1 : index
    %c8_85 = arith.constant 8 : index
    %112 = memref.load %arg2[%c1_84, %c8_85] : memref<6x9xf32, #tpu.memory_space<smem>>
    %113 = vector.broadcast %112 : f32 to vector<16x128xf32>
    %114 = arith.mulf %111, %113 : vector<16x128xf32>
    %115 = arith.addf %109, %114 : vector<16x128xf32>
    %c1_86 = arith.constant 1 : index
    %116 = memref.load %arg3[%c1_86] : memref<6xf32, #tpu.memory_space<smem>>
    %117 = vector.broadcast %116 : f32 to vector<16x128xf32>
    %118 = arith.addf %115, %117 : vector<16x128xf32>
    %cst_87 = arith.constant -2.000000e+00 : f32
    %119 = vector.broadcast %cst_87 : f32 to vector<16x128xf32>
    %120 = arith.maximumf %118, %119 : vector<16x128xf32>
    %cst_88 = arith.constant 1.200000e+01 : f32
    %121 = vector.broadcast %cst_88 : f32 to vector<16x128xf32>
    %122 = arith.minimumf %120, %121 : vector<16x128xf32>
    %c1_89 = arith.constant 1 : index
    %c0_90 = arith.constant 0 : index
    %c0_91 = arith.constant 0 : index
    %123 = vector.load %arg4[%c1_89, %c0_90, %c0_91] : memref<6x16x128xf32, #tpu.memory_space<vmem>>, vector<1x16x128xf32>
    %124 = vector.shape_cast %123 : vector<1x16x128xf32> to vector<16x128xf32>
    %125 = vector.shape_cast %122 : vector<16x128xf32> to vector<1x16x128xf32>
    tpu.vector_store %arg4[%c1_89, %c0_90, %c0_91], %125 {strides = array<i32>} : memref<6x16x128xf32, #tpu.memory_space<vmem>>, vector<1x16x128xf32>,
    %c0_92 = arith.constant 0 : index
    %c0_93 = arith.constant 0 : index
    %c0_94 = arith.constant 0 : index
    %126 = vector.load %arg1[%c0_92, %c0_93, %c0_94] : memref<9x16x128xf32, #tpu.memory_space<vmem>>, vector<1x16x128xf32>
    %127 = vector.shape_cast %126 : vector<1x16x128xf32> to vector<16x128xf32>
    %c2_95 = arith.constant 2 : index
    %c0_96 = arith.constant 0 : index
    %128 = memref.load %arg2[%c2_95, %c0_96] : memref<6x9xf32, #tpu.memory_space<smem>>
    %129 = vector.broadcast %128 : f32 to vector<16x128xf32>
    %130 = arith.mulf %127, %129 : vector<16x128xf32>
    %c1_97 = arith.constant 1 : index
    %c0_98 = arith.constant 0 : index
    %c0_99 = arith.constant 0 : index
    %131 = vector.load %arg1[%c1_97, %c0_98, %c0_99] : memref<9x16x128xf32, #tpu.memory_space<vmem>>, vector<1x16x128xf32>
    %132 = vector.shape_cast %131 : vector<1x16x128xf32> to vector<16x128xf32>
    %c2_100 = arith.constant 2 : index
    %c1_101 = arith.constant 1 : index
    %133 = memref.load %arg2[%c2_100, %c1_101] : memref<6x9xf32, #tpu.memory_space<smem>>
    %134 = vector.broadcast %133 : f32 to vector<16x128xf32>
    %135 = arith.mulf %132, %134 : vector<16x128xf32>
    %136 = arith.addf %130, %135 : vector<16x128xf32>
    %c2_102 = arith.constant 2 : index
    %c0_103 = arith.constant 0 : index
    %c0_104 = arith.constant 0 : index
    %137 = vector.load %arg1[%c2_102, %c0_103, %c0_104] : memref<9x16x128xf32, #tpu.memory_space<vmem>>, vector<1x16x128xf32>
    %138 = vector.shape_cast %137 : vector<1x16x128xf32> to vector<16x128xf32>
    %c2_105 = arith.constant 2 : index
    %c2_106 = arith.constant 2 : index
    %139 = memref.load %arg2[%c2_105, %c2_106] : memref<6x9xf32, #tpu.memory_space<smem>>
    %140 = vector.broadcast %139 : f32 to vector<16x128xf32>
    %141 = arith.mulf %138, %140 : vector<16x128xf32>
    %142 = arith.addf %136, %141 : vector<16x128xf32>
    %c3_107 = arith.constant 3 : index
    %c0_108 = arith.constant 0 : index
    %c0_109 = arith.constant 0 : index
    %143 = vector.load %arg1[%c3_107, %c0_108, %c0_109] : memref<9x16x128xf32, #tpu.memory_space<vmem>>, vector<1x16x128xf32>
    %144 = vector.shape_cast %143 : vector<1x16x128xf32> to vector<16x128xf32>
    %c2_110 = arith.constant 2 : index
    %c3_111 = arith.constant 3 : index
    %145 = memref.load %arg2[%c2_110, %c3_111] : memref<6x9xf32, #tpu.memory_space<smem>>
    %146 = vector.broadcast %145 : f32 to vector<16x128xf32>
    %147 = arith.mulf %144, %146 : vector<16x128xf32>
    %148 = arith.addf %142, %147 : vector<16x128xf32>
    %c4_112 = arith.constant 4 : index
    %c0_113 = arith.constant 0 : index
    %c0_114 = arith.constant 0 : index
    %149 = vector.load %arg1[%c4_112, %c0_113, %c0_114] : memref<9x16x128xf32, #tpu.memory_space<vmem>>, vector<1x16x128xf32>
    %150 = vector.shape_cast %149 : vector<1x16x128xf32> to vector<16x128xf32>
    %c2_115 = arith.constant 2 : index
    %c4_116 = arith.constant 4 : index
    %151 = memref.load %arg2[%c2_115, %c4_116] : memref<6x9xf32, #tpu.memory_space<smem>>
    %152 = vector.broadcast %151 : f32 to vector<16x128xf32>
    %153 = arith.mulf %150, %152 : vector<16x128xf32>
    %154 = arith.addf %148, %153 : vector<16x128xf32>
    %c5_117 = arith.constant 5 : index
    %c0_118 = arith.constant 0 : index
    %c0_119 = arith.constant 0 : index
    %155 = vector.load %arg1[%c5_117, %c0_118, %c0_119] : memref<9x16x128xf32, #tpu.memory_space<vmem>>, vector<1x16x128xf32>
    %156 = vector.shape_cast %155 : vector<1x16x128xf32> to vector<16x128xf32>
    %c2_120 = arith.constant 2 : index
    %c5_121 = arith.constant 5 : index
    %157 = memref.load %arg2[%c2_120, %c5_121] : memref<6x9xf32, #tpu.memory_space<smem>>
    %158 = vector.broadcast %157 : f32 to vector<16x128xf32>
    %159 = arith.mulf %156, %158 : vector<16x128xf32>
    %160 = arith.addf %154, %159 : vector<16x128xf32>
    %c6_122 = arith.constant 6 : index
    %c0_123 = arith.constant 0 : index
    %c0_124 = arith.constant 0 : index
    %161 = vector.load %arg1[%c6_122, %c0_123, %c0_124] : memref<9x16x128xf32, #tpu.memory_space<vmem>>, vector<1x16x128xf32>
    %162 = vector.shape_cast %161 : vector<1x16x128xf32> to vector<16x128xf32>
    %c2_125 = arith.constant 2 : index
    %c6_126 = arith.constant 6 : index
    %163 = memref.load %arg2[%c2_125, %c6_126] : memref<6x9xf32, #tpu.memory_space<smem>>
    %164 = vector.broadcast %163 : f32 to vector<16x128xf32>
    %165 = arith.mulf %162, %164 : vector<16x128xf32>
    %166 = arith.addf %160, %165 : vector<16x128xf32>
    %c7_127 = arith.constant 7 : index
    %c0_128 = arith.constant 0 : index
    %c0_129 = arith.constant 0 : index
    %167 = vector.load %arg1[%c7_127, %c0_128, %c0_129] : memref<9x16x128xf32, #tpu.memory_space<vmem>>, vector<1x16x128xf32>
    %168 = vector.shape_cast %167 : vector<1x16x128xf32> to vector<16x128xf32>
    %c2_130 = arith.constant 2 : index
    %c7_131 = arith.constant 7 : index
    %169 = memref.load %arg2[%c2_130, %c7_131] : memref<6x9xf32, #tpu.memory_space<smem>>
    %170 = vector.broadcast %169 : f32 to vector<16x128xf32>
    %171 = arith.mulf %168, %170 : vector<16x128xf32>
    %172 = arith.addf %166, %171 : vector<16x128xf32>
    %c8_132 = arith.constant 8 : index
    %c0_133 = arith.constant 0 : index
    %c0_134 = arith.constant 0 : index
    %173 = vector.load %arg1[%c8_132, %c0_133, %c0_134] : memref<9x16x128xf32, #tpu.memory_space<vmem>>, vector<1x16x128xf32>
    %174 = vector.shape_cast %173 : vector<1x16x128xf32> to vector<16x128xf32>
    %c2_135 = arith.constant 2 : index
    %c8_136 = arith.constant 8 : index
    %175 = memref.load %arg2[%c2_135, %c8_136] : memref<6x9xf32, #tpu.memory_space<smem>>
    %176 = vector.broadcast %175 : f32 to vector<16x128xf32>
    %177 = arith.mulf %174, %176 : vector<16x128xf32>
    %178 = arith.addf %172, %177 : vector<16x128xf32>
    %c2_137 = arith.constant 2 : index
    %179 = memref.load %arg3[%c2_137] : memref<6xf32, #tpu.memory_space<smem>>
    %180 = vector.broadcast %179 : f32 to vector<16x128xf32>
    %181 = arith.addf %178, %180 : vector<16x128xf32>
    %cst_138 = arith.constant -2.000000e+00 : f32
    %182 = vector.broadcast %cst_138 : f32 to vector<16x128xf32>
    %183 = arith.maximumf %181, %182 : vector<16x128xf32>
    %cst_139 = arith.constant 1.200000e+01 : f32
    %184 = vector.broadcast %cst_139 : f32 to vector<16x128xf32>
    %185 = arith.minimumf %183, %184 : vector<16x128xf32>
    %c2_140 = arith.constant 2 : index
    %c0_141 = arith.constant 0 : index
    %c0_142 = arith.constant 0 : index
    %186 = vector.load %arg4[%c2_140, %c0_141, %c0_142] : memref<6x16x128xf32, #tpu.memory_space<vmem>>, vector<1x16x128xf32>
    %187 = vector.shape_cast %186 : vector<1x16x128xf32> to vector<16x128xf32>
    %188 = vector.shape_cast %185 : vector<16x128xf32> to vector<1x16x128xf32>
    tpu.vector_store %arg4[%c2_140, %c0_141, %c0_142], %188 {strides = array<i32>} : memref<6x16x128xf32, #tpu.memory_space<vmem>>, vector<1x16x128xf32>,
    %c0_143 = arith.constant 0 : index
    %c0_144 = arith.constant 0 : index
    %c0_145 = arith.constant 0 : index
    %189 = vector.load %arg1[%c0_143, %c0_144, %c0_145] : memref<9x16x128xf32, #tpu.memory_space<vmem>>, vector<1x16x128xf32>
    %190 = vector.shape_cast %189 : vector<1x16x128xf32> to vector<16x128xf32>
    %c3_146 = arith.constant 3 : index
    %c0_147 = arith.constant 0 : index
    %191 = memref.load %arg2[%c3_146, %c0_147] : memref<6x9xf32, #tpu.memory_space<smem>>
    %192 = vector.broadcast %191 : f32 to vector<16x128xf32>
    %193 = arith.mulf %190, %192 : vector<16x128xf32>
    %c1_148 = arith.constant 1 : index
    %c0_149 = arith.constant 0 : index
    %c0_150 = arith.constant 0 : index
    %194 = vector.load %arg1[%c1_148, %c0_149, %c0_150] : memref<9x16x128xf32, #tpu.memory_space<vmem>>, vector<1x16x128xf32>
    %195 = vector.shape_cast %194 : vector<1x16x128xf32> to vector<16x128xf32>
    %c3_151 = arith.constant 3 : index
    %c1_152 = arith.constant 1 : index
    %196 = memref.load %arg2[%c3_151, %c1_152] : memref<6x9xf32, #tpu.memory_space<smem>>
    %197 = vector.broadcast %196 : f32 to vector<16x128xf32>
    %198 = arith.mulf %195, %197 : vector<16x128xf32>
    %199 = arith.addf %193, %198 : vector<16x128xf32>
    %c2_153 = arith.constant 2 : index
    %c0_154 = arith.constant 0 : index
    %c0_155 = arith.constant 0 : index
    %200 = vector.load %arg1[%c2_153, %c0_154, %c0_155] : memref<9x16x128xf32, #tpu.memory_space<vmem>>, vector<1x16x128xf32>
    %201 = vector.shape_cast %200 : vector<1x16x128xf32> to vector<16x128xf32>
    %c3_156 = arith.constant 3 : index
    %c2_157 = arith.constant 2 : index
    %202 = memref.load %arg2[%c3_156, %c2_157] : memref<6x9xf32, #tpu.memory_space<smem>>
    %203 = vector.broadcast %202 : f32 to vector<16x128xf32>
    %204 = arith.mulf %201, %203 : vector<16x128xf32>
    %205 = arith.addf %199, %204 : vector<16x128xf32>
    %c3_158 = arith.constant 3 : index
    %c0_159 = arith.constant 0 : index
    %c0_160 = arith.constant 0 : index
    %206 = vector.load %arg1[%c3_158, %c0_159, %c0_160] : memref<9x16x128xf32, #tpu.memory_space<vmem>>, vector<1x16x128xf32>
    %207 = vector.shape_cast %206 : vector<1x16x128xf32> to vector<16x128xf32>
    %c3_161 = arith.constant 3 : index
    %c3_162 = arith.constant 3 : index
    %208 = memref.load %arg2[%c3_161, %c3_162] : memref<6x9xf32, #tpu.memory_space<smem>>
    %209 = vector.broadcast %208 : f32 to vector<16x128xf32>
    %210 = arith.mulf %207, %209 : vector<16x128xf32>
    %211 = arith.addf %205, %210 : vector<16x128xf32>
    %c4_163 = arith.constant 4 : index
    %c0_164 = arith.constant 0 : index
    %c0_165 = arith.constant 0 : index
    %212 = vector.load %arg1[%c4_163, %c0_164, %c0_165] : memref<9x16x128xf32, #tpu.memory_space<vmem>>, vector<1x16x128xf32>
    %213 = vector.shape_cast %212 : vector<1x16x128xf32> to vector<16x128xf32>
    %c3_166 = arith.constant 3 : index
    %c4_167 = arith.constant 4 : index
    %214 = memref.load %arg2[%c3_166, %c4_167] : memref<6x9xf32, #tpu.memory_space<smem>>
    %215 = vector.broadcast %214 : f32 to vector<16x128xf32>
    %216 = arith.mulf %213, %215 : vector<16x128xf32>
    %217 = arith.addf %211, %216 : vector<16x128xf32>
    %c5_168 = arith.constant 5 : index
    %c0_169 = arith.constant 0 : index
    %c0_170 = arith.constant 0 : index
    %218 = vector.load %arg1[%c5_168, %c0_169, %c0_170] : memref<9x16x128xf32, #tpu.memory_space<vmem>>, vector<1x16x128xf32>
    %219 = vector.shape_cast %218 : vector<1x16x128xf32> to vector<16x128xf32>
    %c3_171 = arith.constant 3 : index
    %c5_172 = arith.constant 5 : index
    %220 = memref.load %arg2[%c3_171, %c5_172] : memref<6x9xf32, #tpu.memory_space<smem>>
    %221 = vector.broadcast %220 : f32 to vector<16x128xf32>
    %222 = arith.mulf %219, %221 : vector<16x128xf32>
    %223 = arith.addf %217, %222 : vector<16x128xf32>
    %c6_173 = arith.constant 6 : index
    %c0_174 = arith.constant 0 : index
    %c0_175 = arith.constant 0 : index
    %224 = vector.load %arg1[%c6_173, %c0_174, %c0_175] : memref<9x16x128xf32, #tpu.memory_space<vmem>>, vector<1x16x128xf32>
    %225 = vector.shape_cast %224 : vector<1x16x128xf32> to vector<16x128xf32>
    %c3_176 = arith.constant 3 : index
    %c6_177 = arith.constant 6 : index
    %226 = memref.load %arg2[%c3_176, %c6_177] : memref<6x9xf32, #tpu.memory_space<smem>>
    %227 = vector.broadcast %226 : f32 to vector<16x128xf32>
    %228 = arith.mulf %225, %227 : vector<16x128xf32>
    %229 = arith.addf %223, %228 : vector<16x128xf32>
    %c7_178 = arith.constant 7 : index
    %c0_179 = arith.constant 0 : index
    %c0_180 = arith.constant 0 : index
    %230 = vector.load %arg1[%c7_178, %c0_179, %c0_180] : memref<9x16x128xf32, #tpu.memory_space<vmem>>, vector<1x16x128xf32>
    %231 = vector.shape_cast %230 : vector<1x16x128xf32> to vector<16x128xf32>
    %c3_181 = arith.constant 3 : index
    %c7_182 = arith.constant 7 : index
    %232 = memref.load %arg2[%c3_181, %c7_182] : memref<6x9xf32, #tpu.memory_space<smem>>
    %233 = vector.broadcast %232 : f32 to vector<16x128xf32>
    %234 = arith.mulf %231, %233 : vector<16x128xf32>
    %235 = arith.addf %229, %234 : vector<16x128xf32>
    %c8_183 = arith.constant 8 : index
    %c0_184 = arith.constant 0 : index
    %c0_185 = arith.constant 0 : index
    %236 = vector.load %arg1[%c8_183, %c0_184, %c0_185] : memref<9x16x128xf32, #tpu.memory_space<vmem>>, vector<1x16x128xf32>
    %237 = vector.shape_cast %236 : vector<1x16x128xf32> to vector<16x128xf32>
    %c3_186 = arith.constant 3 : index
    %c8_187 = arith.constant 8 : index
    %238 = memref.load %arg2[%c3_186, %c8_187] : memref<6x9xf32, #tpu.memory_space<smem>>
    %239 = vector.broadcast %238 : f32 to vector<16x128xf32>
    %240 = arith.mulf %237, %239 : vector<16x128xf32>
    %241 = arith.addf %235, %240 : vector<16x128xf32>
    %c3_188 = arith.constant 3 : index
    %242 = memref.load %arg3[%c3_188] : memref<6xf32, #tpu.memory_space<smem>>
    %243 = vector.broadcast %242 : f32 to vector<16x128xf32>
    %244 = arith.addf %241, %243 : vector<16x128xf32>
    %cst_189 = arith.constant -2.000000e+00 : f32
    %245 = vector.broadcast %cst_189 : f32 to vector<16x128xf32>
    %246 = arith.maximumf %244, %245 : vector<16x128xf32>
    %cst_190 = arith.constant 1.200000e+01 : f32
    %247 = vector.broadcast %cst_190 : f32 to vector<16x128xf32>
    %248 = arith.minimumf %246, %247 : vector<16x128xf32>
    %c3_191 = arith.constant 3 : index
    %c0_192 = arith.constant 0 : index
    %c0_193 = arith.constant 0 : index
    %249 = vector.load %arg4[%c3_191, %c0_192, %c0_193] : memref<6x16x128xf32, #tpu.memory_space<vmem>>, vector<1x16x128xf32>
    %250 = vector.shape_cast %249 : vector<1x16x128xf32> to vector<16x128xf32>
    %251 = vector.shape_cast %248 : vector<16x128xf32> to vector<1x16x128xf32>
    tpu.vector_store %arg4[%c3_191, %c0_192, %c0_193], %251 {strides = array<i32>} : memref<6x16x128xf32, #tpu.memory_space<vmem>>, vector<1x16x128xf32>,
    %c0_194 = arith.constant 0 : index
    %c0_195 = arith.constant 0 : index
    %c0_196 = arith.constant 0 : index
    %252 = vector.load %arg1[%c0_194, %c0_195, %c0_196] : memref<9x16x128xf32, #tpu.memory_space<vmem>>, vector<1x16x128xf32>
    %253 = vector.shape_cast %252 : vector<1x16x128xf32> to vector<16x128xf32>
    %c4_197 = arith.constant 4 : index
    %c0_198 = arith.constant 0 : index
    %254 = memref.load %arg2[%c4_197, %c0_198] : memref<6x9xf32, #tpu.memory_space<smem>>
    %255 = vector.broadcast %254 : f32 to vector<16x128xf32>
    %256 = arith.mulf %253, %255 : vector<16x128xf32>
    %c1_199 = arith.constant 1 : index
    %c0_200 = arith.constant 0 : index
    %c0_201 = arith.constant 0 : index
    %257 = vector.load %arg1[%c1_199, %c0_200, %c0_201] : memref<9x16x128xf32, #tpu.memory_space<vmem>>, vector<1x16x128xf32>
    %258 = vector.shape_cast %257 : vector<1x16x128xf32> to vector<16x128xf32>
    %c4_202 = arith.constant 4 : index
    %c1_203 = arith.constant 1 : index
    %259 = memref.load %arg2[%c4_202, %c1_203] : memref<6x9xf32, #tpu.memory_space<smem>>
    %260 = vector.broadcast %259 : f32 to vector<16x128xf32>
    %261 = arith.mulf %258, %260 : vector<16x128xf32>
    %262 = arith.addf %256, %261 : vector<16x128xf32>
    %c2_204 = arith.constant 2 : index
    %c0_205 = arith.constant 0 : index
    %c0_206 = arith.constant 0 : index
    %263 = vector.load %arg1[%c2_204, %c0_205, %c0_206] : memref<9x16x128xf32, #tpu.memory_space<vmem>>, vector<1x16x128xf32>
    %264 = vector.shape_cast %263 : vector<1x16x128xf32> to vector<16x128xf32>
    %c4_207 = arith.constant 4 : index
    %c2_208 = arith.constant 2 : index
    %265 = memref.load %arg2[%c4_207, %c2_208] : memref<6x9xf32, #tpu.memory_space<smem>>
    %266 = vector.broadcast %265 : f32 to vector<16x128xf32>
    %267 = arith.mulf %264, %266 : vector<16x128xf32>
    %268 = arith.addf %262, %267 : vector<16x128xf32>
    %c3_209 = arith.constant 3 : index
    %c0_210 = arith.constant 0 : index
    %c0_211 = arith.constant 0 : index
    %269 = vector.load %arg1[%c3_209, %c0_210, %c0_211] : memref<9x16x128xf32, #tpu.memory_space<vmem>>, vector<1x16x128xf32>
    %270 = vector.shape_cast %269 : vector<1x16x128xf32> to vector<16x128xf32>
    %c4_212 = arith.constant 4 : index
    %c3_213 = arith.constant 3 : index
    %271 = memref.load %arg2[%c4_212, %c3_213] : memref<6x9xf32, #tpu.memory_space<smem>>
    %272 = vector.broadcast %271 : f32 to vector<16x128xf32>
    %273 = arith.mulf %270, %272 : vector<16x128xf32>
    %274 = arith.addf %268, %273 : vector<16x128xf32>
    %c4_214 = arith.constant 4 : index
    %c0_215 = arith.constant 0 : index
    %c0_216 = arith.constant 0 : index
    %275 = vector.load %arg1[%c4_214, %c0_215, %c0_216] : memref<9x16x128xf32, #tpu.memory_space<vmem>>, vector<1x16x128xf32>
    %276 = vector.shape_cast %275 : vector<1x16x128xf32> to vector<16x128xf32>
    %c4_217 = arith.constant 4 : index
    %c4_218 = arith.constant 4 : index
    %277 = memref.load %arg2[%c4_217, %c4_218] : memref<6x9xf32, #tpu.memory_space<smem>>
    %278 = vector.broadcast %277 : f32 to vector<16x128xf32>
    %279 = arith.mulf %276, %278 : vector<16x128xf32>
    %280 = arith.addf %274, %279 : vector<16x128xf32>
    %c5_219 = arith.constant 5 : index
    %c0_220 = arith.constant 0 : index
    %c0_221 = arith.constant 0 : index
    %281 = vector.load %arg1[%c5_219, %c0_220, %c0_221] : memref<9x16x128xf32, #tpu.memory_space<vmem>>, vector<1x16x128xf32>
    %282 = vector.shape_cast %281 : vector<1x16x128xf32> to vector<16x128xf32>
    %c4_222 = arith.constant 4 : index
    %c5_223 = arith.constant 5 : index
    %283 = memref.load %arg2[%c4_222, %c5_223] : memref<6x9xf32, #tpu.memory_space<smem>>
    %284 = vector.broadcast %283 : f32 to vector<16x128xf32>
    %285 = arith.mulf %282, %284 : vector<16x128xf32>
    %286 = arith.addf %280, %285 : vector<16x128xf32>
    %c6_224 = arith.constant 6 : index
    %c0_225 = arith.constant 0 : index
    %c0_226 = arith.constant 0 : index
    %287 = vector.load %arg1[%c6_224, %c0_225, %c0_226] : memref<9x16x128xf32, #tpu.memory_space<vmem>>, vector<1x16x128xf32>
    %288 = vector.shape_cast %287 : vector<1x16x128xf32> to vector<16x128xf32>
    %c4_227 = arith.constant 4 : index
    %c6_228 = arith.constant 6 : index
    %289 = memref.load %arg2[%c4_227, %c6_228] : memref<6x9xf32, #tpu.memory_space<smem>>
    %290 = vector.broadcast %289 : f32 to vector<16x128xf32>
    %291 = arith.mulf %288, %290 : vector<16x128xf32>
    %292 = arith.addf %286, %291 : vector<16x128xf32>
    %c7_229 = arith.constant 7 : index
    %c0_230 = arith.constant 0 : index
    %c0_231 = arith.constant 0 : index
    %293 = vector.load %arg1[%c7_229, %c0_230, %c0_231] : memref<9x16x128xf32, #tpu.memory_space<vmem>>, vector<1x16x128xf32>
    %294 = vector.shape_cast %293 : vector<1x16x128xf32> to vector<16x128xf32>
    %c4_232 = arith.constant 4 : index
    %c7_233 = arith.constant 7 : index
    %295 = memref.load %arg2[%c4_232, %c7_233] : memref<6x9xf32, #tpu.memory_space<smem>>
    %296 = vector.broadcast %295 : f32 to vector<16x128xf32>
    %297 = arith.mulf %294, %296 : vector<16x128xf32>
    %298 = arith.addf %292, %297 : vector<16x128xf32>
    %c8_234 = arith.constant 8 : index
    %c0_235 = arith.constant 0 : index
    %c0_236 = arith.constant 0 : index
    %299 = vector.load %arg1[%c8_234, %c0_235, %c0_236] : memref<9x16x128xf32, #tpu.memory_space<vmem>>, vector<1x16x128xf32>
    %300 = vector.shape_cast %299 : vector<1x16x128xf32> to vector<16x128xf32>
    %c4_237 = arith.constant 4 : index
    %c8_238 = arith.constant 8 : index
    %301 = memref.load %arg2[%c4_237, %c8_238] : memref<6x9xf32, #tpu.memory_space<smem>>
    %302 = vector.broadcast %301 : f32 to vector<16x128xf32>
    %303 = arith.mulf %300, %302 : vector<16x128xf32>
    %304 = arith.addf %298, %303 : vector<16x128xf32>
    %c4_239 = arith.constant 4 : index
    %305 = memref.load %arg3[%c4_239] : memref<6xf32, #tpu.memory_space<smem>>
    %306 = vector.broadcast %305 : f32 to vector<16x128xf32>
    %307 = arith.addf %304, %306 : vector<16x128xf32>
    %cst_240 = arith.constant -2.000000e+00 : f32
    %308 = vector.broadcast %cst_240 : f32 to vector<16x128xf32>
    %309 = arith.maximumf %307, %308 : vector<16x128xf32>
    %cst_241 = arith.constant 1.200000e+01 : f32
    %310 = vector.broadcast %cst_241 : f32 to vector<16x128xf32>
    %311 = arith.minimumf %309, %310 : vector<16x128xf32>
    %c4_242 = arith.constant 4 : index
    %c0_243 = arith.constant 0 : index
    %c0_244 = arith.constant 0 : index
    %312 = vector.load %arg4[%c4_242, %c0_243, %c0_244] : memref<6x16x128xf32, #tpu.memory_space<vmem>>, vector<1x16x128xf32>
    %313 = vector.shape_cast %312 : vector<1x16x128xf32> to vector<16x128xf32>
    %314 = vector.shape_cast %311 : vector<16x128xf32> to vector<1x16x128xf32>
    tpu.vector_store %arg4[%c4_242, %c0_243, %c0_244], %314 {strides = array<i32>} : memref<6x16x128xf32, #tpu.memory_space<vmem>>, vector<1x16x128xf32>,
    %c0_245 = arith.constant 0 : index
    %c0_246 = arith.constant 0 : index
    %c0_247 = arith.constant 0 : index
    %315 = vector.load %arg1[%c0_245, %c0_246, %c0_247] : memref<9x16x128xf32, #tpu.memory_space<vmem>>, vector<1x16x128xf32>
    %316 = vector.shape_cast %315 : vector<1x16x128xf32> to vector<16x128xf32>
    %c5_248 = arith.constant 5 : index
    %c0_249 = arith.constant 0 : index
    %317 = memref.load %arg2[%c5_248, %c0_249] : memref<6x9xf32, #tpu.memory_space<smem>>
    %318 = vector.broadcast %317 : f32 to vector<16x128xf32>
    %319 = arith.mulf %316, %318 : vector<16x128xf32>
    %c1_250 = arith.constant 1 : index
    %c0_251 = arith.constant 0 : index
    %c0_252 = arith.constant 0 : index
    %320 = vector.load %arg1[%c1_250, %c0_251, %c0_252] : memref<9x16x128xf32, #tpu.memory_space<vmem>>, vector<1x16x128xf32>
    %321 = vector.shape_cast %320 : vector<1x16x128xf32> to vector<16x128xf32>
    %c5_253 = arith.constant 5 : index
    %c1_254 = arith.constant 1 : index
    %322 = memref.load %arg2[%c5_253, %c1_254] : memref<6x9xf32, #tpu.memory_space<smem>>
    %323 = vector.broadcast %322 : f32 to vector<16x128xf32>
    %324 = arith.mulf %321, %323 : vector<16x128xf32>
    %325 = arith.addf %319, %324 : vector<16x128xf32>
    %c2_255 = arith.constant 2 : index
    %c0_256 = arith.constant 0 : index
    %c0_257 = arith.constant 0 : index
    %326 = vector.load %arg1[%c2_255, %c0_256, %c0_257] : memref<9x16x128xf32, #tpu.memory_space<vmem>>, vector<1x16x128xf32>
    %327 = vector.shape_cast %326 : vector<1x16x128xf32> to vector<16x128xf32>
    %c5_258 = arith.constant 5 : index
    %c2_259 = arith.constant 2 : index
    %328 = memref.load %arg2[%c5_258, %c2_259] : memref<6x9xf32, #tpu.memory_space<smem>>
    %329 = vector.broadcast %328 : f32 to vector<16x128xf32>
    %330 = arith.mulf %327, %329 : vector<16x128xf32>
    %331 = arith.addf %325, %330 : vector<16x128xf32>
    %c3_260 = arith.constant 3 : index
    %c0_261 = arith.constant 0 : index
    %c0_262 = arith.constant 0 : index
    %332 = vector.load %arg1[%c3_260, %c0_261, %c0_262] : memref<9x16x128xf32, #tpu.memory_space<vmem>>, vector<1x16x128xf32>
    %333 = vector.shape_cast %332 : vector<1x16x128xf32> to vector<16x128xf32>
    %c5_263 = arith.constant 5 : index
    %c3_264 = arith.constant 3 : index
    %334 = memref.load %arg2[%c5_263, %c3_264] : memref<6x9xf32, #tpu.memory_space<smem>>
    %335 = vector.broadcast %334 : f32 to vector<16x128xf32>
    %336 = arith.mulf %333, %335 : vector<16x128xf32>
    %337 = arith.addf %331, %336 : vector<16x128xf32>
    %c4_265 = arith.constant 4 : index
    %c0_266 = arith.constant 0 : index
    %c0_267 = arith.constant 0 : index
    %338 = vector.load %arg1[%c4_265, %c0_266, %c0_267] : memref<9x16x128xf32, #tpu.memory_space<vmem>>, vector<1x16x128xf32>
    %339 = vector.shape_cast %338 : vector<1x16x128xf32> to vector<16x128xf32>
    %c5_268 = arith.constant 5 : index
    %c4_269 = arith.constant 4 : index
    %340 = memref.load %arg2[%c5_268, %c4_269] : memref<6x9xf32, #tpu.memory_space<smem>>
    %341 = vector.broadcast %340 : f32 to vector<16x128xf32>
    %342 = arith.mulf %339, %341 : vector<16x128xf32>
    %343 = arith.addf %337, %342 : vector<16x128xf32>
    %c5_270 = arith.constant 5 : index
    %c0_271 = arith.constant 0 : index
    %c0_272 = arith.constant 0 : index
    %344 = vector.load %arg1[%c5_270, %c0_271, %c0_272] : memref<9x16x128xf32, #tpu.memory_space<vmem>>, vector<1x16x128xf32>
    %345 = vector.shape_cast %344 : vector<1x16x128xf32> to vector<16x128xf32>
    %c5_273 = arith.constant 5 : index
    %c5_274 = arith.constant 5 : index
    %346 = memref.load %arg2[%c5_273, %c5_274] : memref<6x9xf32, #tpu.memory_space<smem>>
    %347 = vector.broadcast %346 : f32 to vector<16x128xf32>
    %348 = arith.mulf %345, %347 : vector<16x128xf32>
    %349 = arith.addf %343, %348 : vector<16x128xf32>
    %c6_275 = arith.constant 6 : index
    %c0_276 = arith.constant 0 : index
    %c0_277 = arith.constant 0 : index
    %350 = vector.load %arg1[%c6_275, %c0_276, %c0_277] : memref<9x16x128xf32, #tpu.memory_space<vmem>>, vector<1x16x128xf32>
    %351 = vector.shape_cast %350 : vector<1x16x128xf32> to vector<16x128xf32>
    %c5_278 = arith.constant 5 : index
    %c6_279 = arith.constant 6 : index
    %352 = memref.load %arg2[%c5_278, %c6_279] : memref<6x9xf32, #tpu.memory_space<smem>>
    %353 = vector.broadcast %352 : f32 to vector<16x128xf32>
    %354 = arith.mulf %351, %353 : vector<16x128xf32>
    %355 = arith.addf %349, %354 : vector<16x128xf32>
    %c7_280 = arith.constant 7 : index
    %c0_281 = arith.constant 0 : index
    %c0_282 = arith.constant 0 : index
    %356 = vector.load %arg1[%c7_280, %c0_281, %c0_282] : memref<9x16x128xf32, #tpu.memory_space<vmem>>, vector<1x16x128xf32>
    %357 = vector.shape_cast %356 : vector<1x16x128xf32> to vector<16x128xf32>
    %c5_283 = arith.constant 5 : index
    %c7_284 = arith.constant 7 : index
    %358 = memref.load %arg2[%c5_283, %c7_284] : memref<6x9xf32, #tpu.memory_space<smem>>
    %359 = vector.broadcast %358 : f32 to vector<16x128xf32>
    %360 = arith.mulf %357, %359 : vector<16x128xf32>
    %361 = arith.addf %355, %360 : vector<16x128xf32>
    %c8_285 = arith.constant 8 : index
    %c0_286 = arith.constant 0 : index
    %c0_287 = arith.constant 0 : index
    %362 = vector.load %arg1[%c8_285, %c0_286, %c0_287] : memref<9x16x128xf32, #tpu.memory_space<vmem>>, vector<1x16x128xf32>
    %363 = vector.shape_cast %362 : vector<1x16x128xf32> to vector<16x128xf32>
    %c5_288 = arith.constant 5 : index
    %c8_289 = arith.constant 8 : index
    %364 = memref.load %arg2[%c5_288, %c8_289] : memref<6x9xf32, #tpu.memory_space<smem>>
    %365 = vector.broadcast %364 : f32 to vector<16x128xf32>
    %366 = arith.mulf %363, %365 : vector<16x128xf32>
    %367 = arith.addf %361, %366 : vector<16x128xf32>
    %c5_290 = arith.constant 5 : index
    %368 = memref.load %arg3[%c5_290] : memref<6xf32, #tpu.memory_space<smem>>
    %369 = vector.broadcast %368 : f32 to vector<16x128xf32>
    %370 = arith.addf %367, %369 : vector<16x128xf32>
    %cst_291 = arith.constant -2.000000e+00 : f32
    %371 = vector.broadcast %cst_291 : f32 to vector<16x128xf32>
    %372 = arith.maximumf %370, %371 : vector<16x128xf32>
    %cst_292 = arith.constant 1.200000e+01 : f32
    %373 = vector.broadcast %cst_292 : f32 to vector<16x128xf32>
    %374 = arith.minimumf %372, %373 : vector<16x128xf32>
    %c5_293 = arith.constant 5 : index
    %c0_294 = arith.constant 0 : index
    %c0_295 = arith.constant 0 : index
    %375 = vector.load %arg4[%c5_293, %c0_294, %c0_295] : memref<6x16x128xf32, #tpu.memory_space<vmem>>, vector<1x16x128xf32>
    %376 = vector.shape_cast %375 : vector<1x16x128xf32> to vector<16x128xf32>
    %377 = vector.shape_cast %374 : vector<16x128xf32> to vector<1x16x128xf32>
    tpu.vector_store %arg4[%c5_293, %c0_294, %c0_295], %377 {strides = array<i32>} : memref<6x16x128xf32, #tpu.memory_space<vmem>>, vector<1x16x128xf32>,
    return
  }
  func.func @transform_0(%arg0: i32) -> (i32, i32, i32) {
    %c0_i32 = arith.constant 0 : i32
    %c0_i32_0 = arith.constant 0 : i32
    %c0_i32_1 = arith.constant 0 : i32
    return %c0_i32, %arg0, %c0_i32_0 : i32, i32, i32
  }
  func.func @transform_1(%arg0: i32) -> (i32, i32) {
    %c0_i32 = arith.constant 0 : i32
    %c0_i32_0 = arith.constant 0 : i32
    %c0_i32_1 = arith.constant 0 : i32
    return %c0_i32, %c0_i32_0 : i32, i32
  }
  func.func @transform_2(%arg0: i32) -> i32 {
    %c0_i32 = arith.constant 0 : i32
    %c0_i32_0 = arith.constant 0 : i32
    return %c0_i32 : i32
  }
  func.func @transform_3(%arg0: i32) -> (i32, i32, i32) {
    %c0_i32 = arith.constant 0 : i32
    %c0_i32_0 = arith.constant 0 : i32
    %c0_i32_1 = arith.constant 0 : i32
    return %c0_i32, %arg0, %c0_i32_0 : i32, i32, i32
  }
}

</mosaic_0001>

<bundles_post_ra>
// kernel: _forward_vpu.1
= control target key start
LH: loop header
LB: loop body
LE: loop exit
PB: predicated region body
PF: predicated region fallthrough
CT: control target
= control target key end

     0   :  { %8 = vsyncpa [#allocation3], 0  ;;  %s1173_s0 = inlined_call_operand.vmem [shape: f32[9,16,128], index: 0, kind: input, shape index: {}]   ;;  %s1174_s1 = inlined_call_operand.vmem [shape: f32[6,9], index: 1, kind: input, shape index: {}]   ;;  %s1175_s2 = inlined_call_operand.vmem [shape: f32[6], index: 2, kind: input, shape index: {}]   ;;  %s1176_s3 = inlined_call_operand.vmem [shape: f32[6,16,128], index: 3, kind: output, shape index: {}]  }
   0x1   :  { %s17_s14 = sshll.u32 %s1174_s1, 4  ;;  %s18_s14 = int_to_ptr.vmem [resolvable:$true] %s17_s14 }
   0x2   :  { %9 = vsyncpa [#allocation5], 0  ;;  %s26_s17 = sshll.u32 %s1175_s2, 4  ;;  %s732_s18 = smov [#allocation2]   ;;  %s27_s17 = int_to_ptr.vmem [resolvable:$true] %s26_s17 }
   0x3   :  { %20 = dma.vmem_to_smem %s18_s14, 128, %s732_s18, [#allocation3]  }
   0x4   :  { %s733_s19 = smov [#allocation4]  }
   0x5   :  { %29 = dma.vmem_to_smem %s27_s17, 16, %s733_s19, [#allocation5]  }
   0x6   :  { %728 = dma.done.wait [#allocation3], 128  }
   0x7   :  { %729 = vsyncadd [#allocation3], 4294967168 }
   0x8   :  { %730 = dma.done.wait [#allocation5], 16  }
   0x9   :  { %731 = vsyncadd [#allocation5], 4294967280 }
   0xa   :  { %38 = sfence }
   0xb   :  { %s41_s20 = sld [smem:[#allocation2]]  ;;  %v765_v0 = vld [vmem:[%s1173_s0] sm:$0xff]  ;;  %v772_v1 = vld [vmem:[%s1173_s0 + $0x8] sm:$0xff]  ;;  %v777_v2 = vld [vmem:[%s1173_s0 + $0x10] sm:$0xff] }
   0xc   :  { %s540_s21 = sld [smem:[#allocation2 + $0x1]]  ;;  %v784_v3 = vld [vmem:[%s1173_s0 + $0x18] sm:$0xff]  ;;  %v789_v5 = vld [vmem:[%s1173_s0 + $0x20] sm:$0xff]  ;;  %v796_v6 = vld [vmem:[%s1173_s0 + $0x28] sm:$0xff] }
   0xd   :  { %s543_s22 = sld [smem:[#allocation2 + $0x2]]  ;;  %v802_v9 = vld [vmem:[%s1173_s0 + $0x30] sm:$0xff]  ;;  %v811_v13 = vld [vmem:[%s1173_s0 + $0x40] sm:$0xff]  ;;  %v819_v15 = vld [vmem:[%s1173_s0 + $0x38] sm:$0xff] }
   0xe   :  { %s760_s1 = sld [smem:[#allocation2 + $0x3]]  ;;  %v829_v19 = vld [vmem:[%s1173_s0 + $0x48] sm:$0xff]  ;;  %v836_v23 = vld [vmem:[%s1173_s0 + $0x50] sm:$0xff]  ;;  %v845_v27 = vld [vmem:[%s1173_s0 + $0x60] sm:$0xff] }
   0xf   :  { %s767_s2 = sld [smem:[#allocation2 + $0x4]]  ;;  %v851_v29 = vld [vmem:[%s1173_s0 + $0x58] sm:$0xff]  ;;  %v859_v32 = vld [vmem:[%s1173_s0 + $0x70] sm:$0xff]  ;;  %v864_v33 = vld [vmem:[%s1173_s0 + $0x80] sm:$0xff] }
  0x10   :  { %s779_s29 = sld [smem:[#allocation2 + $0x5]]  ;;  %v870_v36 = vld [vmem:[%s1173_s0 + $0x68] sm:$0xff]  ;;  %v879_v39 = vld [vmem:[%s1173_s0 + $0x78] sm:$0xff] }
  0x11   :  { %v42_v4 = vstv %s41_s20  ;;  %s791_s7 = sld [smem:[#allocation2 + $0x6]]  ;;  %v888_v44 = vld [vmem:[%s1173_s0 + $0x88] sm:$0xff] }
  0x12   :  { %v43_v7 = vmul.f32 %v42_v4, %v765_v0  ;;  %v49_v8 = vstv %s540_s21  ;;  %s804_s12 = sld [smem:[#allocation2 + $0x7]]  ;;  %v44_v10 = vmul.f32 %v42_v4, %v772_v1 }
  0x13   :  { %v50_v11 = vmul.f32 %v777_v2, %v49_v8  ;;  %v58_v12 = vstv %s543_s22  ;;  %s813_s15 = sld [smem:[#allocation2 + $0x8]]  ;;  %v51_v14 = vmul.f32 %v784_v3, %v49_v8 }
  0x14   :  { %v59_v16 = vmul.f32 %v789_v5, %v58_v12  ;;  %v67_v17 = vstv %s760_s1  ;;  %s823_s18 = sld [smem:[#allocation4]]  ;;  %v60_v18 = vmul.f32 %v796_v6, %v58_v12 }
  0x15   :  { %v52_v20 = vadd.f32 %v50_v11, %v43_v7  ;;  %v68_v21 = vmul.f32 %v802_v9, %v67_v17  ;;  %v76_v22 = vstv %s767_s2  ;;  %v53_v24 = vadd.f32 %v51_v14, %v44_v10  ;;  %s838_s1 = sld [smem:[#allocation2 + $0x80]] }
  0x16   :  { %v77_v25 = vmul.f32 %v811_v13, %v76_v22  ;;  %v85_v26 = vstv %s779_s29  ;;  %v69_v28 = vmul.f32 %v819_v15, %v67_v17  ;;  %s853_s26 = sld [smem:[#allocation2 + $0x81]]  ;;  %v78_v35 = vmul.f32 %v829_v19, %v76_v22 }
  0x17   :  { %v61_v30 = vadd.f32 %v59_v16, %v52_v20  ;;  %v94_v31 = vstv %s791_s7  ;;  %v62_v34 = vadd.f32 %v60_v18, %v53_v24  ;;  %s872_s6 = sld [smem:[#allocation2 + $0x82]]  ;;  %v86_v37 = vmul.f32 %v836_v23, %v85_v26 }
  0x18   :  { %v103_v38 = vstv %s804_s12  ;;  %s881_s9 = sld [smem:[#allocation2 + $0x83]]  ;;  %v87_v43 = vmul.f32 %v851_v29, %v85_v26  ;;  %v95_v45 = vmul.f32 %v845_v27, %v94_v31  ;;  %v96_v48 = vmul.f32 %v870_v36, %v94_v31 }
  0x19   :  { %v70_v40 = vadd.f32 %v68_v21, %v61_v30  ;;  %v112_v41 = vstv %s813_s15  ;;  %v71_v42 = vadd.f32 %v69_v28, %v62_v34  ;;  %s890_s12 = sld [smem:[#allocation2 + $0x84]]  ;;  %v104_v46 = vmul.f32 %v859_v32, %v103_v38 }
  0x1a   :  { %v113_v47 = vmul.f32 %v864_v33, %v112_v41  ;;  %s896_s13 = sld [smem:[#allocation2 + $0x85]]  ;;  %v105_v51 = vmul.f32 %v879_v39, %v103_v38  ;;  %v114_v53 = vmul.f32 %v888_v44, %v112_v41  ;;  %v118_v24 = vstv %s823_s18 }
  0x1b   :  { %v79_v49 = vadd.f32 %v77_v25, %v70_v40  ;;  %v80_v50 = vadd.f32 %v78_v35, %v71_v42  ;;  %v130_v52 = vstv %s838_s1  ;;  %s900_s0 = sld [smem:[#allocation2 + $0x86]] }
  0x1c   :  { %v131_v54 = vmul.f32 %v130_v52, %v765_v0  ;;  %v136_v55 = vstv %s853_s26  ;;  %s905_s14 = sld [smem:[#allocation2 + $0x87]]  ;;  %v132_v56 = vmul.f32 %v130_v52, %v772_v1 }
  0x1d   :  { %v88_v57 = vadd.f32 %v86_v37, %v79_v49  ;;  %v89_v58 = vadd.f32 %v87_v43, %v80_v50  ;;  %v137_v59 = vmul.f32 %v777_v2, %v136_v55  ;;  %v144_v60 = vstv %s872_s6  ;;  %s910_s15 = sld [smem:[#allocation2 + $0x88]] }
  0x1e   :  { %v145_v61 = vmul.f32 %v789_v5, %v144_v60  ;;  %v152_v62 = vstv %s881_s9  ;;  %s914_s16 = sld [smem:[#allocation4 + $0x1]]  ;;  %v138_v63 = vmul.f32 %v784_v3, %v136_v55  ;;  %v146_v4 = vmul.f32 %v796_v6, %v144_v60 }
  0x1f   :  { %v97_v7 = vadd.f32 %v95_v45, %v88_v57  ;;  %v98_v8 = vadd.f32 %v96_v48, %v89_v58  ;;  %v139_v10 = vadd.f32 %v137_v59, %v131_v54  ;;  %v153_v11 = vmul.f32 %v802_v9, %v152_v62  ;;  %s919_s17 = sld [smem:[#allocation2 + $0x100]] }
  0x20   :  { %v160_v12 = vstv %s890_s12  ;;  %v168_v14 = vstv %s896_s13  ;;  %v140_v16 = vadd.f32 %v138_v63, %v132_v56  ;;  %v154_v17 = vmul.f32 %v819_v15, %v152_v62  ;;  %s924_s19 = sld [smem:[#allocation2 + $0x101]] }
  0x21   :  { %v106_v18 = vadd.f32 %v104_v46, %v97_v7  ;;  %v107_v20 = vadd.f32 %v105_v51, %v98_v8  ;;  %v147_v21 = vadd.f32 %v145_v61, %v139_v10  ;;  %v161_v22 = vmul.f32 %v811_v13, %v160_v12  ;;  %s927_s20 = sld [smem:[#allocation2 + $0x102]] }
  0x22   :  { %v176_v25 = vstv %s900_s0  ;;  %v184_v26 = vstv %s905_s14  ;;  %v148_v28 = vadd.f32 %v146_v4, %v140_v16  ;;  %s932_s21 = sld [smem:[#allocation2 + $0x103]]  ;;  %v169_v35 = vmul.f32 %v836_v23, %v168_v14 }
  0x23   :  { %v115_v30 = vadd.f32 %v113_v47, %v106_v18  ;;  %v116_v31 = vadd.f32 %v114_v53, %v107_v20  ;;  %v155_v34 = vadd.f32 %v153_v11, %v147_v21  ;;  %s935_s22 = sld [smem:[#allocation2 + $0x104]]  ;;  %v177_v37 = vmul.f32 %v845_v27, %v176_v25 }
  0x24   :  { %v192_v38 = vstv %s910_s15  ;;  %v156_v40 = vadd.f32 %v154_v17, %v148_v28  ;;  %s939_s1 = sld [smem:[#allocation2 + $0x105]]  ;;  %v185_v45 = vmul.f32 %v859_v32, %v184_v26  ;;  %v162_v47 = vmul.f32 %v829_v19, %v160_v12 }
  0x25   :  { %v119_v41 = vadd.f32 %v118_v24, %v115_v30  ;;  %v120_v42 = vadd.f32 %v118_v24, %v116_v31  ;;  %v163_v43 = vadd.f32 %v161_v22, %v155_v34  ;;  %s942_s18 = sld [smem:[#allocation2 + $0x106]]  ;;  %v193_v46 = vmul.f32 %v864_v33, %v192_v38 }
  0x26   :  { %v170_v48 = vmul.f32 %v851_v29, %v168_v14  ;;  %v178_v49 = vmul.f32 %v870_v36, %v176_v25  ;;  %s948_s23 = sld [smem:[#allocation2 + $0x107]]  ;;  %v186_v53 = vmul.f32 %v879_v39, %v184_v26  ;;  %v164_v54 = vadd.f32 %v162_v47, %v156_v40 }
  0x27   :  { %v121_v50 = vmax.f32 %v119_v41, -2.0  ;;  %v122_v51 = vmax.f32 %v120_v42, -2.0  ;;  %v171_v52 = vadd.f32 %v169_v35, %v163_v43  ;;  %s951_s24 = sld [smem:[#allocation2 + $0x108]]  ;;  %v211_v55 = vstv %s919_s17 }
  0x28   :  { %v217_v56 = vstv %s924_s19  ;;  %v225_v57 = vstv %s927_s20  ;;  %v212_v61 = vmul.f32 %v211_v55, %v765_v0  ;;  %s957_s2 = sld [smem:[#allocation4 + $0x2]]  ;;  %v172_v62 = vadd.f32 %v170_v48, %v164_v54 }
  0x29   :  { %v123_v58 = vmin.f32 %v121_v50, 12.0  ;;  %v124_v59 = vmin.f32 %v122_v51, 12.0  ;;  %v179_v60 = vadd.f32 %v177_v37, %v171_v52  ;;  %v218_v63 = vmul.f32 %v777_v2, %v217_v56  ;;  %s962_s25 = sld [smem:[#allocation2 + $0x180]] }
  0x2a   :  { %v226_v4 = vmul.f32 %v789_v5, %v225_v57  ;;  %v233_v7 = vstv %s932_s21  ;;  %v198_v10 = vstv %s914_s16  ;;  %v194_v11 = vmul.f32 %v888_v44, %v192_v38  ;;  %s970_s28 = sld [smem:[#allocation2 + $0x181]] }
  0x2b   :  { %125 = vst [vmem:[%s1176_s3] sm:$0xff] %v123_v58  ;;  %v187_v8 = vadd.f32 %v185_v45, %v179_v60  ;;  %v241_v12 = vstv %s935_s22  ;;  %v180_v14 = vadd.f32 %v178_v49, %v172_v62  ;;  %v220_v16 = vadd.f32 %v218_v63, %v212_v61  ;;  %s977_s4 = sld [smem:[#allocation2 + $0x182]] }
  0x2c   :  { %126 = vst [vmem:[%s1176_s3 + $0x8] sm:$0xff] %v124_v59  ;;  %v234_v17 = vmul.f32 %v802_v9, %v233_v7  ;;  %v249_v18 = vstv %s939_s1  ;;  %v242_v21 = vmul.f32 %v811_v13, %v241_v12  ;;  %v257_v22 = vstv %s942_s18  ;;  %s981_s5 = sld [smem:[#allocation2 + $0x183]] }
  0x2d   :  { %v195_v20 = vadd.f32 %v193_v46, %v187_v8  ;;  %v188_v24 = vadd.f32 %v186_v53, %v180_v14  ;;  %v228_v25 = vadd.f32 %v226_v4, %v220_v16  ;;  %v265_v26 = vstv %s948_s23  ;;  %s987_s6 = sld [smem:[#allocation2 + $0x184]] }
  0x2e   :  { %v273_v28 = vstv %s951_s24  ;;  %v250_v31 = vmul.f32 %v836_v23, %v249_v18  ;;  %v213_v34 = vmul.f32 %v211_v55, %v772_v1  ;;  %v219_v38 = vmul.f32 %v784_v3, %v217_v56  ;;  %s991_s7 = sld [smem:[#allocation2 + $0x185]] }
  0x2f   :  { %v199_v30 = vadd.f32 %v198_v10, %v195_v20  ;;  %v196_v35 = vadd.f32 %v194_v11, %v188_v24  ;;  %v236_v37 = vadd.f32 %v234_v17, %v228_v25  ;;  %v227_v40 = vmul.f32 %v796_v6, %v225_v57  ;;  %s996_s8 = sld [smem:[#allocation2 + $0x186]] }
  0x30   :  { %v258_v42 = vmul.f32 %v845_v27, %v257_v22  ;;  %v266_v43 = vmul.f32 %v859_v32, %v265_v26  ;;  %v274_v45 = vmul.f32 %v864_v33, %v273_v28  ;;  %v221_v48 = vadd.f32 %v219_v38, %v213_v34  ;;  %s999_s9 = sld [smem:[#allocation2 + $0x187]] }
  0x31   :  { %v201_v41 = vmax.f32 %v199_v30, -2.0  ;;  %v200_v46 = vadd.f32 %v198_v10, %v196_v35  ;;  %v244_v47 = vadd.f32 %v242_v21, %v236_v37  ;;  %v235_v49 = vmul.f32 %v819_v15, %v233_v7  ;;  %s1004_s10 = sld [smem:[#allocation2 + $0x188]] }
  0x32   :  { %v279_v51 = vstv %s957_s2  ;;  %v243_v52 = vmul.f32 %v829_v19, %v241_v12  ;;  %v292_v53 = vstv %s962_s25  ;;  %v229_v56 = vadd.f32 %v227_v40, %v221_v48  ;;  %s1015_s13 = sld [smem:[#allocation2 + $0x200]] }
  0x33   :  { %v203_v50 = vmin.f32 %v201_v41, 12.0  ;;  %v202_v54 = vmax.f32 %v200_v46, -2.0  ;;  %v252_v55 = vadd.f32 %v250_v31, %v244_v47  ;;  %v293_v57 = vmul.f32 %v292_v53, %v765_v0  ;;  %s1021_s0 = sld [smem:[#allocation2 + $0x201]] }
  0x34   :  { %v251_v58 = vmul.f32 %v851_v29, %v249_v18  ;;  %v298_v59 = vstv %s970_s28  ;;  %v306_v60 = vstv %s977_s4  ;;  %v314_v61 = vstv %s981_s5  ;;  %s1027_s16 = sld [smem:[#allocation2 + $0x202]] }
  0x35   :  { %588 = vst [vmem:[%s1176_s3 + $0x10] sm:$0xff] %v203_v50  ;;  %v204_v62 = vmin.f32 %v202_v54, 12.0  ;;  %v260_v63 = vadd.f32 %v258_v42, %v252_v55  ;;  %v237_v4 = vadd.f32 %v235_v49, %v229_v56  ;;  %v299_v7 = vmul.f32 %v777_v2, %v298_v59  ;;  %s1033_s17 = sld [smem:[#allocation2 + $0x203]] }
  0x36   :  { %v259_v8 = vmul.f32 %v870_v36, %v257_v22  ;;  %v307_v10 = vmul.f32 %v789_v5, %v306_v60  ;;  %v315_v11 = vmul.f32 %v802_v9, %v314_v61  ;;  %v322_v12 = vstv %s987_s6  ;;  %s1040_s19 = sld [smem:[#allocation2 + $0x204]] }
  0x37   :  { %589 = vst [vmem:[%s1176_s3 + $0x18] sm:$0xff] %v204_v62  ;;  %v268_v14 = vadd.f32 %v266_v43, %v260_v63  ;;  %v245_v16 = vadd.f32 %v243_v52, %v237_v4  ;;  %v301_v17 = vadd.f32 %v299_v7, %v293_v57  ;;  %v330_v18 = vstv %s991_s7  ;;  %s1045_s20 = sld [smem:[#allocation2 + $0x205]] }
  0x38   :  { %v267_v20 = vmul.f32 %v879_v39, %v265_v26  ;;  %v323_v21 = vmul.f32 %v811_v13, %v322_v12  ;;  %v338_v22 = vstv %s996_s8  ;;  %v294_v24 = vmul.f32 %v292_v53, %v772_v1  ;;  %s1049_s21 = sld [smem:[#allocation4 + $0x3]] }
  0x39   :  { %v276_v25 = vadd.f32 %v274_v45, %v268_v14  ;;  %v253_v30 = vadd.f32 %v251_v58, %v245_v16  ;;  %v309_v31 = vadd.f32 %v307_v10, %v301_v17  ;;  %v346_v34 = vstv %s999_s9  ;;  %s1053_s22 = sld [smem:[#allocation2 + $0x206]] }
  0x3a   :  { %v275_v35 = vmul.f32 %v888_v44, %v273_v28  ;;  %v331_v37 = vmul.f32 %v836_v23, %v330_v18  ;;  %v354_v38 = vstv %s1004_s10  ;;  %v300_v40 = vmul.f32 %v784_v3, %v298_v59  ;;  %s1058_s1 = sld [smem:[#allocation2 + $0x207]] }
  0x3b   :  { %v280_v26 = vadd.f32 %v279_v51, %v276_v25  ;;  %v261_v41 = vadd.f32 %v259_v8, %v253_v30  ;;  %v317_v42 = vadd.f32 %v315_v11, %v309_v31  ;;  %v308_v43 = vmul.f32 %v796_v6, %v306_v60  ;;  %s1061_s18 = sld [smem:[#allocation2 + $0x208]] }
  0x3c   :  { %v339_v45 = vmul.f32 %v845_v27, %v338_v22  ;;  %v347_v28 = vmul.f32 %v859_v32, %v346_v34  ;;  %v302_v46 = vadd.f32 %v300_v40, %v294_v24  ;;  %v316_v47 = vmul.f32 %v819_v15, %v314_v61  ;;  %s1073_s25 = sld [smem:[#allocation4 + $0x4]] }
  0x3d   :  { %v282_v48 = vmax.f32 %v280_v26, -2.0  ;;  %v269_v49 = vadd.f32 %v267_v20, %v261_v41  ;;  %v325_v50 = vadd.f32 %v323_v21, %v317_v42  ;;  %v355_v52 = vmul.f32 %v864_v33, %v354_v38  ;;  %s1078_s26 = sld [smem:[#allocation2 + $0x280]] }
  0x3e   :  { %v310_v53 = vadd.f32 %v308_v43, %v302_v46  ;;  %v324_v54 = vmul.f32 %v829_v19, %v322_v12  ;;  %v332_v55 = vmul.f32 %v851_v29, %v330_v18  ;;  %v373_v56 = vstv %s1015_s13  ;;  %s1081_s2 = sld [smem:[#allocation2 + $0x281]] }
  0x3f   :  { %v284_v57 = vmin.f32 %v282_v48, 12.0  ;;  %v277_v58 = vadd.f32 %v275_v35, %v269_v49  ;;  %v333_v59 = vadd.f32 %v331_v37, %v325_v50  ;;  %v374_v60 = vmul.f32 %v373_v56, %v765_v0  ;;  %s1086_s27 = sld [smem:[#allocation2 + $0x282]] }
  0x40   :  { %v318_v61 = vadd.f32 %v316_v47, %v310_v53  ;;  %v379_v62 = vstv %s1021_s0  ;;  %v387_v63 = vstv %s1027_s16  ;;  %v395_v4 = vstv %s1033_s17  ;;  %s1089_s28 = sld [smem:[#allocation2 + $0x283]] }
  0x41   :  { %616 = vst [vmem:[%s1176_s3 + $0x20] sm:$0xff] %v284_v57  ;;  %v281_v7 = vadd.f32 %v279_v51, %v277_v58  ;;  %v341_v8 = vadd.f32 %v339_v45, %v333_v59  ;;  %v380_v10 = vmul.f32 %v777_v2, %v379_v62  ;;  %v388_v11 = vmul.f32 %v789_v5, %v387_v63  ;;  %s1099_s4 = sld [smem:[#allocation2 + $0x284]] }
  0x42   :  { %v326_v12 = vadd.f32 %v324_v54, %v318_v61  ;;  %v340_v14 = vmul.f32 %v870_v36, %v338_v22  ;;  %v396_v16 = vmul.f32 %v802_v9, %v395_v4  ;;  %v403_v17 = vstv %s1040_s19  ;;  %s1104_s5 = sld [smem:[#allocation2 + $0x285]] }
  0x43   :  { %v283_v18 = vmax.f32 %v281_v7, -2.0  ;;  %v349_v20 = vadd.f32 %v347_v28, %v341_v8  ;;  %v382_v21 = vadd.f32 %v380_v10, %v374_v60  ;;  %v411_v51 = vstv %s1045_s20  ;;  %s1110_s6 = sld [smem:[#allocation2 + $0x286]] }
  0x44   :  { %v360_v24 = vstv %s1049_s21  ;;  %v334_v25 = vadd.f32 %v332_v55, %v326_v12  ;;  %v348_v30 = vmul.f32 %v879_v39, %v346_v34  ;;  %v404_v22 = vmul.f32 %v811_v13, %v403_v17  ;;  %s1114_s7 = sld [smem:[#allocation2 + $0x287]] }
  0x45   :  { %v285_v31 = vmin.f32 %v283_v18, 12.0  ;;  %v357_v35 = vadd.f32 %v355_v52, %v349_v20  ;;  %v390_v37 = vadd.f32 %v388_v11, %v382_v21  ;;  %v419_v40 = vstv %s1053_s22  ;;  %s1126_s10 = sld [smem:[#allocation2 + $0x288]] }
  0x46   :  { %v342_v26 = vadd.f32 %v340_v14, %v334_v25  ;;  %v356_v41 = vmul.f32 %v888_v44, %v354_v38  ;;  %v412_v42 = vmul.f32 %v836_v23, %v411_v51  ;;  %v427_v43 = vstv %s1058_s1  ;;  %s1143_s13 = sld [smem:[#allocation4 + $0x5]] }
  0x47   :  { %617 = vst [vmem:[%s1176_s3 + $0x28] sm:$0xff] %v285_v31  ;;  %v361_v34 = vadd.f32 %v360_v24, %v357_v35  ;;  %v398_v45 = vadd.f32 %v396_v16, %v390_v37  ;;  %v435_v28 = vstv %s1061_s18  ;;  %v375_v46 = vmul.f32 %v373_v56, %v772_v1 }
  0x48   :  { %v350_v47 = vadd.f32 %v348_v30, %v342_v26  ;;  %v420_v48 = vmul.f32 %v845_v27, %v419_v40  ;;  %v381_v38 = vmul.f32 %v784_v3, %v379_v62  ;;  %v389_v49 = vmul.f32 %v796_v6, %v387_v63 }
  0x49   :  { %v363_v50 = vmax.f32 %v361_v34, -2.0  ;;  %v406_v52 = vadd.f32 %v404_v22, %v398_v45  ;;  %v428_v53 = vmul.f32 %v859_v32, %v427_v43  ;;  %v441_v54 = vstv %s1073_s25 }
  0x4a   :  { %v358_v55 = vadd.f32 %v356_v41, %v350_v47  ;;  %v436_v56 = vmul.f32 %v864_v33, %v435_v28  ;;  %v383_v57 = vadd.f32 %v381_v38, %v375_v46  ;;  %v397_v58 = vmul.f32 %v819_v15, %v395_v4 }
  0x4b   :  { %v365_v59 = vmin.f32 %v363_v50, 12.0  ;;  %v414_v60 = vadd.f32 %v412_v42, %v406_v52  ;;  %v405_v61 = vmul.f32 %v829_v19, %v403_v17  ;;  %v454_v62 = vstv %s1078_s26 }
  0x4c   :  { %v362_v63 = vadd.f32 %v360_v24, %v358_v55  ;;  %v391_v7 = vadd.f32 %v389_v49, %v383_v57  ;;  %v455_v8 = vmul.f32 %v454_v62, %v765_v0  ;;  %v460_v10 = vstv %s1081_s2 }
  0x4d   :  { %644 = vst [vmem:[%s1176_s3 + $0x30] sm:$0xff] %v365_v59  ;;  %v422_v4 = vadd.f32 %v420_v48, %v414_v60  ;;  %v461_v11 = vmul.f32 %v777_v2, %v460_v10  ;;  %v468_v12 = vstv %s1086_s27  ;;  %v476_v14 = vstv %s1089_s28 }
  0x4e   :  { %v364_v16 = vmax.f32 %v362_v63, -2.0  ;;  %v399_v17 = vadd.f32 %v397_v58, %v391_v7  ;;  %v413_v18 = vmul.f32 %v851_v29, %v411_v51  ;;  %v469_v20 = vmul.f32 %v789_v5, %v468_v12 }
  0x4f   :  { %v430_v0 = vadd.f32 %v428_v53, %v422_v4  ;;  %v463_v21 = vadd.f32 %v461_v11, %v455_v8  ;;  %v477_v24 = vmul.f32 %v802_v9, %v476_v14  ;;  %v484_v25 = vstv %s1099_s4 }
  0x50   :  { %v366_v30 = vmin.f32 %v364_v16, 12.0  ;;  %v407_v2 = vadd.f32 %v405_v61, %v399_v17  ;;  %v421_v22 = vmul.f32 %v870_v36, %v419_v40  ;;  %v492_v31 = vstv %s1104_s5 }
  0x51   :  { %v438_v35 = vadd.f32 %v436_v56, %v430_v0  ;;  %v471_v37 = vadd.f32 %v469_v20, %v463_v21  ;;  %v485_v51 = vmul.f32 %v811_v13, %v484_v25  ;;  %v429_v26 = vmul.f32 %v879_v39, %v427_v43 }
  0x52   :  { %645 = vst [vmem:[%s1176_s3 + $0x38] sm:$0xff] %v366_v30  ;;  %v415_v5 = vadd.f32 %v413_v18, %v407_v2  ;;  %v437_v9 = vmul.f32 %v888_v44, %v435_v28  ;;  %v500_v41 = vstv %s1110_s6  ;;  %v493_v40 = vmul.f32 %v836_v23, %v492_v31 }
  0x53   :  { %v442_v42 = vadd.f32 %v441_v54, %v438_v35  ;;  %v479_v34 = vadd.f32 %v477_v24, %v471_v37  ;;  %v508_v45 = vstv %s1114_s7  ;;  %v456_v13 = vmul.f32 %v454_v62, %v772_v1 }
  0x54   :  { %v423_v46 = vadd.f32 %v421_v22, %v415_v5  ;;  %v462_v47 = vmul.f32 %v784_v3, %v460_v10  ;;  %v470_v48 = vmul.f32 %v796_v6, %v468_v12  ;;  %v501_v28 = vmul.f32 %v845_v27, %v500_v41 }
  0x55   :  { %v444_v43 = vmax.f32 %v442_v42, -2.0  ;;  %v487_v38 = vadd.f32 %v485_v51, %v479_v34  ;;  %v516_v50 = vstv %s1126_s10  ;;  %v478_v23 = vmul.f32 %v819_v15, %v476_v14 }
  0x56   :  { %v431_v49 = vadd.f32 %v429_v26, %v423_v46  ;;  %v464_v52 = vadd.f32 %v462_v47, %v456_v13  ;;  %v509_v56 = vmul.f32 %v859_v32, %v508_v45  ;;  %v486_v3 = vmul.f32 %v829_v19, %v484_v25 }
  0x57   :  { %v446_v53 = vmin.f32 %v444_v43, 12.0  ;;  %v495_v55 = vadd.f32 %v493_v40, %v487_v38  ;;  %v517_v27 = vmul.f32 %v864_v33, %v516_v50  ;;  %v494_v15 = vmul.f32 %v851_v29, %v492_v31 }
  0x58   :  { %v439_v1 = vadd.f32 %v437_v9, %v431_v49  ;;  %v472_v57 = vadd.f32 %v470_v48, %v464_v52  ;;  %v522_v62 = vstv %s1143_s13  ;;  %v502_v63 = vmul.f32 %v870_v36, %v500_v41 }
  0x59   :  { %672 = vst [vmem:[%s1176_s3 + $0x40] sm:$0xff] %v446_v53  ;;  %v503_v6 = vadd.f32 %v501_v28, %v495_v55  ;;  %v510_v10 = vmul.f32 %v879_v39, %v508_v45 }
  0x5a   :  { %v443_v58 = vadd.f32 %v441_v54, %v439_v1  ;;  %v480_v59 = vadd.f32 %v478_v23, %v472_v57  ;;  %v518_v54 = vmul.f32 %v888_v44, %v516_v50 }
  0x5b   :  { %v511_v60 = vadd.f32 %v509_v56, %v503_v6 }
  0x5c   :  { %v445_v61 = vmax.f32 %v443_v58, -2.0  ;;  %v488_v32 = vadd.f32 %v486_v3, %v480_v59 }
  0x5d   :  { %v519_v7 = vadd.f32 %v517_v27, %v511_v60 }
  0x5e   :  { %v447_v19 = vmin.f32 %v445_v61, 12.0  ;;  %v496_v8 = vadd.f32 %v494_v15, %v488_v32 }
  0x5f   :  { %v523_v4 = vadd.f32 %v522_v62, %v519_v7 }
  0x60   :  { %673 = vst [vmem:[%s1176_s3 + $0x48] sm:$0xff] %v447_v19  ;;  %v504_v33 = vadd.f32 %v502_v63, %v496_v8 }
  0x61   :  { %v525_v29 = vmax.f32 %v523_v4, -2.0 }
  0x62   :  { %v512_v11 = vadd.f32 %v510_v10, %v504_v33 }
  0x63   :  { %v527_v12 = vmin.f32 %v525_v29, 12.0 }
  0x64   :  { %v520_v14 = vadd.f32 %v518_v54, %v512_v11 }
  0x65   :  { %700 = vst [vmem:[%s1176_s3 + $0x50] sm:$0xff] %v527_v12 }
  0x66   :  { %v524_v36 = vadd.f32 %v522_v62, %v520_v14 }
  0x68   :  { %v526_v16 = vmax.f32 %v524_v36, -2.0 }
  0x6a   :  { %v528_v17 = vmin.f32 %v526_v16, 12.0 }
  0x6c   :  { %701 = vst [vmem:[%s1176_s3 + $0x58] sm:$0xff] %v528_v17 }
  0x6d   :  { %536 = vsyncpa [#allocation3], 1 }
  0x6e   :  { %537 = vsyncpa [#allocation5], 1 }

</bundles_post_ra>
